<compile_context>
chip_gen: v5e
topology: v5e:2x2
jax: 0.10.0
libtpu: 0.0.40
codegen_flags: <defaults>
</compile_context>

<pallas_src>
import functools

import jax
import jax.numpy as jnp
from jax.experimental import pallas as pl
from jax.experimental.pallas import tpu as pltpu


# ----------------------------------------------------------------------------- utils

def _tpu_vmem_bytes():
    """Physical VMEM per TensorCore (128 MiB v5e/v6e, 64 MiB v7x); safe fallback."""
    try:
        return int(pltpu.get_tpu_info().vmem_capacity_bytes)
    except Exception:
        return 64 * 2**20            # conservative (v7x-sized) fallback


def _scoped_vmem(vmem_cap):
    # Generous scoped-VMEM request (a limit, not an allocation): ~3/4 of physical
    # comfortably covers double-buffered input blocks plus compiler f32 temporaries
    # at the tile budgets below, while leaving headroom for the surrounding program.
    return int(max(32 * 2**20, int(0.75 * vmem_cap)))


def _default_tile_budget(vmem_cap):
    # Bigger tiles amortize the ~0.35 us per-grid-step overhead (measured sweep:
    # large tiles ~85% of HBM roofline vs ~30% for tiny ones); keep the
    # double-buffered block + in-kernel f32 temps well inside VMEM per generation.
    if vmem_cap >= 96 * 2**20:       # v5e / v6e: 128 MiB physical
        return 6 * 2**20
    return 3 * 2**20                 # v7x: 64 MiB physical per TC


def _pick_tiles_ncw(B, C, HW, itemsize, max_tile_bytes):
    """Pick (b_tile, c_tile, hw_tile) for a [B, C, HW] input block.

    Channels sit on sublanes, spatial on lanes. hw_tile stays the full HW unless
    even a minimal-channel slab would blow the budget AND HW is a multiple of 128,
    in which case the largest fitting multiple-of-128 divisor of HW is used (so
    partial/masked spatial tiles never occur). c_tile / b_tile are exact divisors
    of C / B. The (b, c) parallel block count is kept >= 2 so both v7x
    TensorCores get work (one extra, cheap grid step on single-TC chips).
    """
    sub = 16 if itemsize < 4 else 8          # native sublane packing per dtype
    c_opts = sorted({d for d in range(1, C + 1)
                     if C % d == 0 and (d % sub == 0 or d == C)}, reverse=True)
    c_min = c_opts[-1]

    hw_tile = HW
    if c_min * HW * itemsize > max_tile_bytes and HW % 128 == 0:
        hw_tile = 128
        for t in sorted({d for d in range(128, HW + 1)
                         if HW % d == 0 and d % 128 == 0}, reverse=True):
            if c_min * t * itemsize <= max_tile_bytes:
                hw_tile = t
                break

    c_tile = c_min
    for c in c_opts:                          # descending -> largest fitting tile
        if c * hw_tile * itemsize <= max_tile_bytes:
            c_tile = c
            break

    tile_bytes = c_tile * hw_tile * itemsize
    b_tile = max(1, min(B, max_tile_bytes // tile_bytes))
    while B % b_tile:
        b_tile -= 1

    # Megacore: guarantee >= 2 parallel (b, c) blocks whenever splitting is possible.
    if b_tile == B and c_tile == C:
        if B > 1:
            b_tile = max(d for d in range(1, B) if B % d == 0)
        elif len(c_opts) > 1:
            c_tile = c_opts[1]
    return int(b_tile), int(c_tile), int(hw_tile)


# ------------------------------------------------------------------ reduction kernels

def _max_gem_reduce_kernel(x_ref, max_ref, cube_ref):
    """Running spatial max + running sum of clamp(x,1e-6)^3 over the HW grid axis."""
    h = pl.program_id(2)
    x = x_ref[...]                                            # [BT, CT, HWT], input dtype
    # Spatial max in the input dtype (exact for max; bf16 keeps 2 elems/lane slot).
    t_max = jnp.max(x, axis=-1, keepdims=True).astype(jnp.float32)
    # GeM clamp in the input dtype (only affects |x| < 1e-6, error ~1e-21 in the cube
    # sum), then cast once; cube + accumulate in f32 for accuracy (bf16 x*x rejected).
    xc = jnp.maximum(x, 1e-6).astype(jnp.float32)
    t_cube = jnp.sum(xc * xc * xc, axis=-1, keepdims=True)    # [BT, CT, 1]

    @pl.when(h == 0)
    def _():
        max_ref[...] = t_max
        cube_ref[...] = t_cube

    @pl.when(h > 0)
    def _():
        max_ref[...] = jnp.maximum(max_ref[...], t_max)
        cube_ref[...] = cube_ref[...] + t_cube


def _sum_reduce_kernel(x_ref, sum_ref):
    """Running spatial sum over the HW grid axis (GAP of local_feat)."""
    h = pl.program_id(2)
    t_sum = jnp.sum(x_ref[...].astype(jnp.float32), axis=-1, keepdims=True)

    @pl.when(h == 0)
    def _():
        sum_ref[...] = t_sum

    @pl.when(h > 0)
    def _():
        sum_ref[...] = sum_ref[...] + t_sum


def _spatial_reduce(x, *, kind, max_tile_bytes, vmem_cap):
    """x: [B, C, HW] (NCHW with H,W merged; any float dtype) -> f32 [B, C, 1]."""
    B, C, HW = x.shape
    b_tile, c_tile, hw_tile = _pick_tiles_ncw(B, C, HW, x.dtype.itemsize,
                                              max_tile_bytes)
    grid = (B // b_tile, C // c_tile, HW // hw_tile)

    in_spec = pl.BlockSpec((b_tile, c_tile, hw_tile), lambda b, c, h: (b, c, h))

    def out_spec():
        # Output block resident across the hw (reduction) axis; lane dim is 1
        # (lane-sparse store) which is fine — the [B, C] outputs are tiny.
        return pl.BlockSpec((b_tile, c_tile, 1), lambda b, c, h: (b, c, 0))

    n_out = 2 if kind == "max_gem" else 1
    params = pltpu.CompilerParams(
        # b/c axes write disjoint output blocks -> "parallel" (2-TC split on v7x);
        # the hw axis accumulates into the resident output block -> "arbitrary", last.
        dimension_semantics=("parallel", "parallel", "arbitrary"),
        vmem_limit_bytes=_scoped_vmem(vmem_cap))
    cost = pl.CostEstimate(
        flops=int((5 if kind == "max_gem" else 1) * x.size),
        transcendentals=0,
        bytes_accessed=int(x.size * x.dtype.itemsize + n_out * B * C * 4))

    if kind == "max_gem":
        return pl.pallas_call(
            _max_gem_reduce_kernel,
            out_shape=(jax.ShapeDtypeStruct((B, C, 1), jnp.float32),
                       jax.ShapeDtypeStruct((B, C, 1), jnp.float32)),
            grid=grid,
            in_specs=[in_spec],
            out_specs=(out_spec(), out_spec()),
            compiler_params=params,
            cost_estimate=cost,
        )(x)

    return pl.pallas_call(
        _sum_reduce_kernel,
        out_shape=jax.ShapeDtypeStruct((B, C, 1), jnp.float32),
        grid=grid,
        in_specs=[in_spec],
        out_specs=out_spec(),
        compiler_params=params,
        cost_estimate=cost,
    )(x)


# -------------------------------------------------------------------- epilogue kernel

def _head_epilogue_kernel(gd0_ref, cube_ref, lsum_ref,
                          w01_ref, b01_ref, gamma_ref, beta_ref,
                          wa_ref, ba_ref, w2_ref, b2_ref,
                          feat_ref, cls_ref, *, inv_hwg, inv_hwl):
    gd0 = gd0_ref[...]                                        # [B, C] f32
    gd1 = (cube_ref[...] * inv_hwg) ** (1.0 / 3.0)            # GeM finalize (EUP pow)
    lm = lsum_ref[...] * inv_hwl                              # GAP(local_feat)

    # main_moduels: two Linear(C, C, bias=True) as one batched MXU pass.
    # Activations are cast to the weight dtype (bf16 for large C) -> native MXU rate;
    # accumulation stays f32 via preferred_element_type.
    w01 = w01_ref[...]
    gd = jnp.stack([gd0, gd1], axis=0)                        # [2, B, C]
    y = jnp.einsum("nbc,nck->nbk", gd.astype(w01.dtype), w01,
                   preferred_element_type=jnp.float32) + b01_ref[...]

    # auxiliary_module: BatchNorm1d (train-mode batch stats, biased var) + Linear.
    # TODO(synk): per-device batch stats — not synced across data-parallel shards.
    y0 = y[0]
    mu = jnp.mean(y0, axis=0, keepdims=True)
    var = jnp.mean((y0 - mu) * (y0 - mu), axis=0, keepdims=True)
    bn = (y0 - mu) * jax.lax.rsqrt(var + 1e-5) * gamma_ref[...] + beta_ref[...]
    wa = wa_ref[...]
    cls = jnp.dot(bn.astype(wa.dtype), wa,
                  preferred_element_type=jnp.float32) + ba_ref[...]
    cls_ref[...] = cls.astype(cls_ref.dtype)

    # OrthogonalFusion + GAP (folded analytically) + fc_2_module (Linear + L2Norm),
    # both descriptors handled together as one batched pass.
    lm_b = lm[None]                                           # [1, B, C]
    dot = jnp.sum(y * lm_b, axis=-1, keepdims=True)           # [2, B, 1]
    nrm2 = jnp.sum(y * y, axis=-1, keepdims=True)             # [2, B, 1]
    orth = lm_b - y * (dot / nrm2)    # no eps, matches PyTorch (all-zero y -> NaN)
    z = jnp.concatenate([y, orth], axis=-1)                   # [2, B, 2C]
    w2 = w2_ref[...]
    f = jnp.einsum("nbc,nck->nbk", z.astype(w2.dtype), w2,
                   preferred_element_type=jnp.float32) + b2_ref[...]
    # F.normalize(p=2, dim=-1, eps=1e-12) via rsqrt (EUP slot).
    f = f * jax.lax.rsqrt(jnp.maximum(jnp.sum(f * f, axis=-1, keepdims=True), 1e-24))
    feat_ref[...] = jnp.concatenate([f[0], f[1]], axis=-1).astype(feat_ref.dtype)


def _head_epilogue(gd0, cube_sum, local_sum, params, *, inv_hwg, inv_hwl, vmem_cap):
    B, C = gd0.shape
    NC = params["wa"].shape[1]
    K = params["w2"].shape[2]
    args = (gd0, cube_sum, local_sum,
            params["w01"], params["b01"], params["gamma"], params["beta"],
            params["wa"], params["ba"], params["w2"], params["b2"])

    def full_spec(shape):
        return pl.BlockSpec(shape, lambda i: (0,) * len(shape))

    in_bytes = sum(int(a.size) * a.dtype.itemsize for a in args)
    out_bytes = B * 2 * K * 4 + B * NC * 4
    cost = pl.CostEstimate(
        flops=int(2 * (2 * B * C * C) + 2 * B * C * NC + 2 * (2 * B * 2 * C * K)
                  + 12 * B * C),
        transcendentals=int(2 * B * C + 4 * B),
        bytes_accessed=int(in_bytes + out_bytes))

    # TODO(synk): for very large feature_dim the whole-array weight blocks could be
    # tiled over C / 2C, and this epilogue could be folded into the last grid step of
    # the local_feat sum-reduce to save two launches + the [B,C] HBM roundtrip.
    kernel = functools.partial(_head_epilogue_kernel,
                               inv_hwg=inv_hwg, inv_hwl=inv_hwl)
    feat, classes = pl.pallas_call(
        kernel,
        out_shape=(jax.ShapeDtypeStruct((B, 2 * K), jnp.float32),
                   jax.ShapeDtypeStruct((B, NC), jnp.float32)),
        grid=(1,),
        in_specs=[full_spec(a.shape) for a in args],
        out_specs=(full_spec((B, 2 * K)), full_spec((B, NC))),
        compiler_params=pltpu.CompilerParams(
            dimension_semantics=("arbitrary",),
            vmem_limit_bytes=_scoped_vmem(vmem_cap)),
        cost_estimate=cost,
    )(*args)
    return feat, classes


# -------------------------------------------------------------------------- forward

def cgdolg_head_forward(xg_nchw, local_nchw, params, *, max_tile_bytes=None,
                        epilogue_weights_bf16=None):
    """CGDolgNet5 head forward.

    xg_nchw:    backbone deep feature map `output[1]`, [B, C, Hg, Wg]
    local_nchw: DolgLocalBranch output `local_feat`,   [B, C, Hl, Wl]
    Returns (feat [B, output_dim], classes [B, num_classes]).

    max_tile_bytes: per-buffer input tile budget for the reduction kernels; None
    derives it from the detected VMEM capacity (~6 MiB on v5e/v6e, ~3 MiB on v7x).
    """
    B, C, Hg, Wg = xg_nchw.shape
    Bl, Cl, Hl, Wl = local_nchw.shape
    assert (Bl, Cl) == (B, C), "local_feat and global feature map must share [B, C]"

    vmem_cap = _tpu_vmem_bytes()
    if max_tile_bytes is None:
        max_tile_bytes = _default_tile_budget(vmem_cap)

    # NCHW consumed directly: merging H,W is a free reshape (no HBM transpose pass).
    # Channels sit on sublanes, spatial on lanes; the kernels reduce over the lane axis.
    xg = xg_nchw.reshape(B, C, Hg * Wg)
    lf = local_nchw.reshape(B, C, Hl * Wl)

    gd0, cube_sum = _spatial_reduce(xg, kind="max_gem",
                                    max_tile_bytes=max_tile_bytes, vmem_cap=vmem_cap)
    local_sum = _spatial_reduce(lf, kind="sum",
                                max_tile_bytes=max_tile_bytes, vmem_cap=vmem_cap)

    gd0 = jnp.squeeze(gd0, axis=-1)
    cube_sum = jnp.squeeze(cube_sum, axis=-1)
    local_sum = jnp.squeeze(local_sum, axis=-1)

    # For production-sized C (>= 512) keep the epilogue weight blocks bf16 so they fit
    # v7x VMEM and run the MXU at native bf16 rate (f32 accumulation in-kernel).
    if epilogue_weights_bf16 is None:
        epilogue_weights_bf16 = C >= 512
    if epilogue_weights_bf16:
        params = dict(params)
        for k in ("w01", "w2", "wa"):
            params[k] = params[k].astype(jnp.bfloat16)

    return _head_epilogue(gd0, cube_sum, local_sum, params, vmem_cap=vmem_cap,
                          inv_hwg=1.0 / (Hg * Wg), inv_hwl=1.0 / (Hl * Wl))


# ------------------------------------------------------------------------- reference

def cgdolg_head_reference(xg_nchw, local_nchw, params):
    """Literal pure-JAX port of the PyTorch head (materializes the fused tensor)."""
    xg = xg_nchw.astype(jnp.float32)
    lf = local_nchw.astype(jnp.float32)
    B, C, _, _ = xg.shape

    # CGD3 global descriptors + main linears
    gd0 = jnp.max(xg, axis=(2, 3))
    gd1 = jnp.mean(jnp.maximum(xg, 1e-6) ** 3, axis=(2, 3)) ** (1.0 / 3.0)
    y0 = gd0 @ params["w01"][0] + params["b01"][0]
    y1 = gd1 @ params["w01"][1] + params["b01"][1]

    # auxiliary_module: BatchNorm1d (train mode, biased var) + Linear
    mu = y0.mean(axis=0, keepdims=True)
    var = ((y0 - mu) ** 2).mean(axis=0, keepdims=True)
    bn = (y0 - mu) / jnp.sqrt(var + 1e-5) * params["gamma"] + params["beta"]
    classes = bn @ params["wa"] + params["ba"]

    # OrthogonalFusion + GAP + fc_2_module, computed the literal way
    lflat = lf.reshape(B, C, -1)                                     # [B, C, HW]
    feats = []
    for i, g in enumerate([y0, y1]):
        gnorm2 = jnp.sum(g * g, axis=1)                              # [B]
        proj = jnp.einsum("bc,bcs->bs", g, lflat)                    # [B, HW]
        proj = jnp.einsum("bc,bs->bcs", g, proj) / gnorm2[:, None, None]
        orth = lflat - proj                                          # [B, C, HW]
        fused = jnp.concatenate(
            [jnp.broadcast_to(g[:, :, None], orth.shape), orth], axis=1)  # [B, 2C, HW]
        gap = fused.mean(axis=-1)                                    # [B, 2C]
        f = gap @ params["w2"][i] + params["b2"][i]
        f = f / jnp.maximum(jnp.linalg.norm(f, axis=-1, keepdims=True), 1e-12)
        feats.append(f)
    return jnp.concatenate(feats, axis=-1), classes


# ---------------------------------------------------------------------------- params

def init_params(key, feature_dim, num_classes, output_dim):
    """Head parameters, stored as [in, out] (transposed vs PyTorch nn.Linear)."""
    C = feature_dim
    K = output_dim // 2                     # gd_config='MG' -> n=2 -> ks=[O//2, O//2]
    ks = jax.random.split(key, 10)

    def linear(kw, kb, fan_in, fan_out):
        bound = 1.0 / (fan_in ** 0.5)
        w = jax.random.uniform(kw, (fan_in, fan_out), jnp.float32, -bound, bound)
        b = jax.random.uniform(kb, (1, fan_out), jnp.float32, -bound, bound)
        return w, b

    w0, b0 = linear(ks[0], ks[1], C, C)             # main_moduels[0]
    w1, b1 = linear(ks[2], ks[3], C, C)             # main_moduels[1]
    wa, ba = linear(ks[4], ks[5], C, num_classes)   # auxiliary Linear
    w2a, b2a = linear(ks[6], ks[7], 2 * C, K)       # fc_2_module[0]
    w2b, b2b = linear(ks[8], ks[9], 2 * C, K)       # fc_2_module[1]
    return {
        "w01": jnp.stack([w0, w1], axis=0),         # [2, C, C]
        "b01": jnp.stack([b0, b1], axis=0),         # [2, 1, C]
        "gamma": jnp.ones((1, C), jnp.float32),     # BatchNorm1d weight
        "beta": jnp.zeros((1, C), jnp.float32),     # BatchNorm1d bias
        "wa": wa, "ba": ba,                         # [C, NC], [1, NC]
        "w2": jnp.stack([w2a, w2b], axis=0),        # [2, 2C, K]
        "b2": jnp.stack([b2a, b2b], axis=0),        # [2, 1, K]
    }


# ------------------------------------------------------------------------------ main

if __name__ == "__main__":
    # Small shapes consistent with the module: feature_dim == hidden_dim (= C),
    # deep map Hg x Wg (backbone stage 4), local map Hl x Wl (stage 3, 2x larger).
    B, C = 8, 128
    Hg, Wg = 8, 8
    Hl, Wl = 16, 16
    NUM_CLASSES, OUTPUT_DIM = 16, 32

    key = jax.random.PRNGKey(0)
    kx, kl, kp = jax.random.split(key, 3)
    # Feed the reduction kernels bf16 feature maps (halves HBM traffic);
    # accumulation inside the kernel is f32.
    xg = jax.random.normal(kx, (B, C, Hg, Wg), jnp.float32).astype(jnp.bfloat16)
    lf = jax.random.normal(kl, (B, C, Hl, Wl), jnp.float32).astype(jnp.bfloat16)
    params = init_params(kp, C, NUM_CLASSES, OUTPUT_DIM)

    # Tiny tile budget so the demo exercises multi-step grids on all axes
    # (batch/channels -> "parallel", spatial -> "arbitrary" accumulation);
    # production default (max_tile_bytes=None) derives the budget from get_tpu_info.
    feat, classes = cgdolg_head_forward(xg, lf, params, max_tile_bytes=4 * 1024)
    feat = jax.block_until_ready(feat)
    classes = jax.block_until_ready(classes)

    feat_ref, cls_ref = cgdolg_head_reference(xg, lf, params)
    assert feat.shape == (B, OUTPUT_DIM) and classes.shape == (B, NUM_CLASSES)
    assert jnp.allclose(feat, feat_ref, rtol=2e-3, atol=2e-3), \
        float(jnp.max(jnp.abs(feat - feat_ref)))
    assert jnp.allclose(classes, cls_ref, rtol=2e-3, atol=2e-3), \
        float(jnp.max(jnp.abs(classes - cls_ref)))

    print("KERNEL_OK")
</pallas_src>

<mosaic_0001>
module attributes {stable_mosaic.version = 11 : i64} {
  func.func @_max_gem_reduce_kernel(%arg0: i32, %arg1: i32, %arg2: i32, %arg3: memref<1x32x64xbf16, #tpu.memory_space<vmem>>, %arg4: memref<1x32x1xf32, #tpu.memory_space<vmem>>, %arg5: memref<1x32x1xf32, #tpu.memory_space<vmem>>) attributes {dimension_semantics = [#tpu.dimension_semantics<parallel>, #tpu.dimension_semantics<parallel>, #tpu.dimension_semantics<arbitrary>], iteration_bounds = array<i64: 8, 4, 1>, scalar_prefetch = 0 : i64, scratch_operands = 0 : i64, tpu.core_type = #tpu.core_type<tc>, window_params = [{transform_indices = @transform_0, window_bounds = array<i64: 1, 32, 64>}, {transform_indices = @transform_1, window_bounds = array<i64: 1, 32, 1>}, {transform_indices = @transform_2, window_bounds = array<i64: 1, 32, 1>}]} {
    %c0 = arith.constant 0 : index
    %c0_0 = arith.constant 0 : index
    %c0_1 = arith.constant 0 : index
    %0 = vector.load %arg3[%c0, %c0_0, %c0_1] : memref<1x32x64xbf16, #tpu.memory_space<vmem>>, vector<1x32x64xbf16>
    %cst = arith.constant dense<0xFF80> : vector<1x32xbf16>
    %1 = vector.multi_reduction <maximumf>, %0, %cst [2] : vector<1x32x64xbf16> to vector<1x32xbf16>
    %2 = vector.shape_cast %1 : vector<1x32xbf16> to vector<1x32x1xbf16>
    %3 = arith.extf %2 : vector<1x32x1xbf16> to vector<1x32x1xf32>
    %cst_2 = arith.constant 9.983770e-07 : bf16
    %4 = vector.broadcast %cst_2 : bf16 to vector<1x32x64xbf16>
    %5 = arith.maximumf %0, %4 : vector<1x32x64xbf16>
    %6 = arith.extf %5 : vector<1x32x64xbf16> to vector<1x32x64xf32>
    %7 = arith.mulf %6, %6 : vector<1x32x64xf32>
    %8 = arith.mulf %7, %6 : vector<1x32x64xf32>
    %cst_3 = arith.constant dense<0.000000e+00> : vector<1x32xf32>
    %9 = vector.multi_reduction <add>, %8, %cst_3 [2] : vector<1x32x64xf32> to vector<1x32xf32>
    %10 = vector.shape_cast %9 : vector<1x32xf32> to vector<1x32x1xf32>
    %c0_i32 = arith.constant 0 : i32
    %11 = arith.cmpi eq, %arg2, %c0_i32 : i32
    %12 = arith.extui %11 : i1 to i32
    %c0_i32_4 = arith.constant 0 : i32
    %13 = arith.cmpi ne, %12, %c0_i32_4 : i32
    scf.if %13 {
      %c0_7 = arith.constant 0 : index
      %c0_8 = arith.constant 0 : index
      %c0_9 = arith.constant 0 : index
      %17 = vector.load %arg4[%c0_7, %c0_8, %c0_9] : memref<1x32x1xf32, #tpu.memory_space<vmem>>, vector<1x32x1xf32>
      tpu.vector_store %arg4[%c0_7, %c0_8, %c0_9], %3 {strides = array<i32>} : memref<1x32x1xf32, #tpu.memory_space<vmem>>, vector<1x32x1xf32>,
      %c0_10 = arith.constant 0 : index
      %c0_11 = arith.constant 0 : index
      %c0_12 = arith.constant 0 : index
      %18 = vector.load %arg5[%c0_10, %c0_11, %c0_12] : memref<1x32x1xf32, #tpu.memory_space<vmem>>, vector<1x32x1xf32>
      tpu.vector_store %arg5[%c0_10, %c0_11, %c0_12], %10 {strides = array<i32>} : memref<1x32x1xf32, #tpu.memory_space<vmem>>, vector<1x32x1xf32>,
    } else {
    }
    %c0_i32_5 = arith.constant 0 : i32
    %14 = arith.cmpi sgt, %arg2, %c0_i32_5 : i32
    %15 = arith.extui %14 : i1 to i32
    %c0_i32_6 = arith.constant 0 : i32
    %16 = arith.cmpi ne, %15, %c0_i32_6 : i32
    scf.if %16 {
      %c0_7 = arith.constant 0 : index
      %c0_8 = arith.constant 0 : index
      %c0_9 = arith.constant 0 : index
      %17 = vector.load %arg4[%c0_7, %c0_8, %c0_9] : memref<1x32x1xf32, #tpu.memory_space<vmem>>, vector<1x32x1xf32>
      %18 = arith.maximumf %17, %3 : vector<1x32x1xf32>
      %c0_10 = arith.constant 0 : index
      %c0_11 = arith.constant 0 : index
      %c0_12 = arith.constant 0 : index
      %19 = vector.load %arg4[%c0_10, %c0_11, %c0_12] : memref<1x32x1xf32, #tpu.memory_space<vmem>>, vector<1x32x1xf32>
      tpu.vector_store %arg4[%c0_10, %c0_11, %c0_12], %18 {strides = array<i32>} : memref<1x32x1xf32, #tpu.memory_space<vmem>>, vector<1x32x1xf32>,
      %c0_13 = arith.constant 0 : index
      %c0_14 = arith.constant 0 : index
      %c0_15 = arith.constant 0 : index
      %20 = vector.load %arg5[%c0_13, %c0_14, %c0_15] : memref<1x32x1xf32, #tpu.memory_space<vmem>>, vector<1x32x1xf32>
      %21 = arith.addf %20, %10 : vector<1x32x1xf32>
      %c0_16 = arith.constant 0 : index
      %c0_17 = arith.constant 0 : index
      %c0_18 = arith.constant 0 : index
      %22 = vector.load %arg5[%c0_16, %c0_17, %c0_18] : memref<1x32x1xf32, #tpu.memory_space<vmem>>, vector<1x32x1xf32>
      tpu.vector_store %arg5[%c0_16, %c0_17, %c0_18], %21 {strides = array<i32>} : memref<1x32x1xf32, #tpu.memory_space<vmem>>, vector<1x32x1xf32>,
    } else {
    }
    return
  }
  func.func @transform_0(%arg0: i32, %arg1: i32, %arg2: i32) -> (i32, i32, i32) {
    %c0_i32 = arith.constant 0 : i32
    return %arg0, %arg1, %arg2 : i32, i32, i32
  }
  func.func @transform_1(%arg0: i32, %arg1: i32, %arg2: i32) -> (i32, i32, i32) {
    %c0_i32 = arith.constant 0 : i32
    %c0_i32_0 = arith.constant 0 : i32
    return %arg0, %arg1, %c0_i32 : i32, i32, i32
  }
  func.func @transform_2(%arg0: i32, %arg1: i32, %arg2: i32) -> (i32, i32, i32) {
    %c0_i32 = arith.constant 0 : i32
    %c0_i32_0 = arith.constant 0 : i32
    return %arg0, %arg1, %c0_i32 : i32, i32, i32
  }
}

</mosaic_0001>

<bundles_post_ra>
// kernel: tpu_custom_call.1
= control target key start
LH: loop header
LB: loop body
LE: loop exit
PB: predicated region body
PF: predicated region fallthrough
CT: control target
= control target key end

     0   :  { %s594_s9 = smov 0   ;;  %s596_s10 = smov 0   ;;  %s668_s0 = inlined_call_operand.vmem [shape: bf16[8,128,64], index: 0, kind: input, shape index: {}]   ;;  %s669_s1 = inlined_call_operand.vmem [shape: f32[8,128,1], index: 1, kind: output, shape index: {0}]   ;;  %s670_s2 = inlined_call_operand.vmem [shape: f32[8,128,1], index: 2, kind: output, shape index: {1}]  }
   0x1   :  { %s598_s11 = smov 0   ;;  %s600_s12 = smov 0  }
   0x2   :  { %s602_s13 = smov 0  }
   0x3 LB: > { %s28_s14 = sadd.s32 1, %s569_s11  ;;  %s32_s15 = sadd.s32 1, %s573_s12  ;;  %s577_s13 = sphi %s602_s13, %s13_s13   ;;  %s573_s12 = sphi %s600_s12, %s674_s12   ;;  %s569_s11 = sphi %s598_s11, %s673_s11   ;;  %s565_s10 = sphi %s596_s10, %s672_s10   ;;  %s561_s9 = sphi %s594_s9, %s671_s9  }
   0x4   : > { %p30_p0 = scmp.ge.s32.totalorder %s28_s14, 4  ;;  %p478_p1 = scmp.ge.s32.totalorder %s577_s13, 1 }
   0x5   : > { %p150_p2 = scmp.lt.s32.totalorder %s577_s13, 33 }
   0x6   : > { %s676_s14 = smov (%p30_p0, %s28_s14), 0  ;;  %s678_s15 = smov (!%p30_p0, %s32_s15), %s573_s12 }
   0x7   : > { %p151_p3 = pnand %p478_p1, %p150_p2  ;;  %p34_p4 = scmp.ge.s32.totalorder %s678_s15, 8 }
   0x8   : > { %s479_s16 = sshll.u32 (!%p151_p3), %s561_s9, 2  ;;  %p193_p5 = scmp.lt.s32.totalorder (!%p151_p3), %s565_s10, 7 }
   0x9   : > { %s680_s15 = smov (%p34_p4, %s678_s15), 0  ;;  %154 = sbr.rel (%p151_p3) target bundleno = 158 (0x9e), region = 24 }
   0xa   : > { %p195_p6 = scmp.lt.s32.totalorder (!%p151_p3), %s479_s16, 15 }
   0xe   : > { %s682_s10 = smov (!%p193_p5, %s565_s10), 7  ;;  %s684_s16 = smov (!%p195_p6, %s479_s16), 15  ;;  %vm233_vm0 = vcmask 523264   ;;  %vm290_vm1 = vcmask 7168  }
   0xf   : > { %s480_s17 = sshll.u32 %s682_s10, 4 }
  0x10   : > { %s624_s18 = sadd.s32 %s480_s17, %s684_s16 }
  0x11   : > { %s481_s19 = sshll.u32 %s624_s18, 2  ;;  %s484_s23 = sshll.u32 %s624_s18, 3 }
  0x12   : > { %s203_s22 = scalar_lea.vmem %s668_s0, %s481_s19  ;;  %s213_s26 = scalar_lea.vmem %s669_s1, %s484_s23 }
  0x13   : > { %v498_v0 = vld [vmem:[%s203_s22 + $0x8] sm:$0xff]   ;;  %v491_v1 = vld [vmem:[%s203_s22] sm:$0xff]   ;;  %s223_s29 = scalar_lea.vmem %s670_s2, %s484_s23 }
  0x14   : > { %v496_v2 = vunpack.c.l.bf16 %v498_v0  ;;  %v492_v3 = vunpack.c.l.bf16 %v491_v1  ;;  %v497_v4 = vunpack.c.h.bf16 %v498_v0  ;;  %v493_v5 = vunpack.c.h.bf16 %v491_v1 }
  0x16   : > { %v240_v6 = vsel %vm233_vm0, %v496_v2, -inf  ;;  %v256_v7 = vmax.f32 %v496_v2, 9.983778e-07  ;;  %v234_v8 = vsel %vm233_vm0, %v492_v3, -inf  ;;  %v254_v9 = vmax.f32 %v492_v3, 9.983778e-07 }
  0x17   : > { %241 = vmax.xlane.f32.xlu1 %v240_v6  ;;  %235 = vmax.xlane.f32.xlu0 %v234_v8  ;;  %v257_v10 = vmax.f32 %v497_v4, 9.983778e-07  ;;  %v255_v11 = vmax.f32 %v493_v5, 9.983778e-07  ;;  %v243_v20 = vsel %vm233_vm0, %v497_v4, -inf  ;;  %v237_v22 = vsel %vm233_vm0, %v493_v5, -inf }
  0x18   : > { %v260_v12 = vpack.c.bf16 %v256_v7, %v256_v7  ;;  %v258_v13 = vpack.c.bf16 %v254_v9, %v254_v9 }
  0x19   : > { %v261_v14 = vpack.c.bf16 %v257_v10, %v257_v10  ;;  %v259_v15 = vpack.c.bf16 %v255_v11, %v255_v11 }
  0x1a   : > { %v262_v16 = vunpack.c.l.bf16 %v258_v13  ;;  %v264_v17 = vunpack.c.l.bf16 %v260_v12 }
  0x1b   : > { %v265_v18 = vunpack.c.l.bf16 %v261_v14  ;;  %v263_v19 = vunpack.c.l.bf16 %v259_v15 }
  0x1c   : > { %v266_v21 = vmul.f32 %v262_v16, %v262_v16  ;;  %v268_v23 = vmul.f32 %v264_v17, %v264_v17 }
  0x1d   : > { %v269_v24 = vmul.f32 %v265_v18, %v265_v18  ;;  %v267_v26 = vmul.f32 %v263_v19, %v263_v19 }
  0x1e   : > { %v270_v25 = vmul.f32 %v266_v21, %v262_v16  ;;  %v272_v29 = vmul.f32 %v268_v23, %v264_v17 }
  0x1f   : > { %244 = vmax.xlane.f32.xlu1 %v243_v20  ;;  %238 = vmax.xlane.f32.xlu0 %v237_v22  ;;  %v273_v28 = vmul.f32 %v269_v24, %v265_v18  ;;  %v271_v30 = vmul.f32 %v267_v26, %v263_v19 }
  0x20   : > { %v274_v27 = vsel %vm233_vm0, %v270_v25, 0.0  ;;  %v280_v32 = vsel %vm233_vm0, %v272_v29, 0.0 }
  0x21   : > { %275 = vadd.xlane.f32.xlu2 %v274_v27  ;;  %v283_v31 = vsel %vm233_vm0, %v273_v28, 0.0  ;;  %v277_v33 = vsel %vm233_vm0, %v271_v30, 0.0 }
  0x27   : > { %284 = vadd.xlane.f32.xlu1 %v283_v31  ;;  %281 = vadd.xlane.f32.xlu0 %v280_v32 }
  0x29   : > { %278 = vadd.xlane.f32.xlu2 %v277_v33 }
  0x8a   : > { %v242_v34 = vpop.xlane.xlu1 %241  ;;  %v236_v35 = vpop.xlane.xlu0 %235 }
  0x8b   : > { %v248_v36 = vpack.c.bf16 %v242_v34, %v242_v34  ;;  %v246_v37 = vpack.c.bf16 %v236_v35, %v236_v35 }
  0x8d   : > { %v252_v38 = vunpack.c.l.bf16 %v248_v36  ;;  %v250_v39 = vunpack.c.l.bf16 %v246_v37 }
  0x8f   : > { %293 = vst.msk [vmem:[%s213_s26 + $0x10] sm:$0xff] %vm290_vm1, %v252_v38 }
  0x90   : > { %291 = vst.msk [vmem:[%s213_s26] sm:$0xff] %vm290_vm1, %v250_v39 }
  0x92   : > { %v245_v40 = vpop.xlane.xlu1 %244  ;;  %v239_v41 = vpop.xlane.xlu0 %238 }
  0x93   : > { %v249_v42 = vpack.c.bf16 %v245_v40, %v245_v40  ;;  %v247_v43 = vpack.c.bf16 %v239_v41, %v239_v41 }
  0x94   : > { %v276_v44 = vpop.xlane.xlu2 %275 }
  0x95   : > { %v253_v45 = vunpack.c.l.bf16 %v249_v42  ;;  %295 = vst.msk [vmem:[%s223_s29] sm:$0xff] %vm290_vm1, %v276_v44  ;;  %v251_v46 = vunpack.c.l.bf16 %v247_v43 }
  0x97   : > { %294 = vst.msk [vmem:[%s213_s26 + $0x18] sm:$0xff] %vm290_vm1, %v253_v45 }
  0x98   : > { %292 = vst.msk [vmem:[%s213_s26 + $0x8] sm:$0xff] %vm290_vm1, %v251_v46 }
  0x9a   : > { %v285_v47 = vpop.xlane.xlu1 %284  ;;  %v282_v48 = vpop.xlane.xlu0 %281 }
  0x9b   : > { %298 = vst.msk [vmem:[%s223_s29 + $0x18] sm:$0xff] %vm290_vm1, %v285_v47 }
  0x9c   : > { %v279_v49 = vpop.xlane.xlu2 %278  ;;  %297 = vst.msk [vmem:[%s223_s29 + $0x10] sm:$0xff] %vm290_vm1, %v282_v48 }
  0x9d   : > { %296 = vst.msk [vmem:[%s223_s29 + $0x8] sm:$0xff] %vm290_vm1, %v279_v49 }
  0x9e PF: > { %s13_s13 = sadd.s32 1, %s577_s13   ;;  %s671_s9 = smov %s569_s11 }
  0x9f   : > { %p10_p7 = scmp.ge.s32.totalorder %s13_s13, 34   ;;  %s672_s10 = smov %s573_s12 }
  0xa0   : > { %s673_s11 = smov %s676_s14  ;;  %s674_s12 = smov %s680_s15 }
  0xa1   :  { %12 = sbr.rel (!%p10_p7) target bundleno = 3 (0x3), region = 74 }

</bundles_post_ra>
